<compile_context>
chip_gen: v6e
topology: v6e:2x2x1
jax: 0.10.0
libtpu: 0.0.40
codegen_flags: <defaults>
</compile_context>

<pallas_src>
import jax
import jax.numpy as jnp
from jax import lax
from jax.experimental import pallas as pl
from jax.experimental.pallas import tpu as pltpu


def _round_up(x, m):
    return ((x + m - 1) // m) * m


def rnnlm_kernel(ids_ref, wxh_ref, whh_ref, bh_ref, whq_ref, bq_ref, out_ref):
    """Single-invocation kernel (grid=()).

    ids_ref : (T*Bp, 1) int32, VMEM — token ids, time-major rows (t*Bp + b)
    wxh_ref : (Vp, Hp)  f32,  VMEM  — input/embedding weights
    whh_ref : (Hp, Hp)  f32,  VMEM
    bh_ref  : (1, Hp)   f32,  VMEM
    whq_ref : (Hp, Vp)  f32,  VMEM
    bq_ref  : (1, Vp)   f32,  VMEM
    out_ref : (Bp, T*Vp) f32, VMEM  — batch-major, lane-dense output slab
    """
    Bp = out_ref.shape[0]
    Vp = bq_ref.shape[1]
    T = out_ref.shape[1] // Vp
    Hp = whh_ref.shape[0]
    TB = ids_ref.shape[0]            # == T * Bp

    # --- one_hot(X) built in-kernel, then ALL embeddings in one MXU matmul ---
    ids = ids_ref[...]                                            # (T*Bp, 1)
    lane = lax.broadcasted_iota(jnp.int32, (TB, Vp), 1)           # lane iota
    onehot = (lane == ids).astype(jnp.float32)                    # (T*Bp, Vp)
    emb_all = jnp.dot(onehot, wxh_ref[...],
                      preferred_element_type=jnp.float32)         # (T*Bp, Hp)

    # --- recurrence: fully unrolled, static slices only ---
    whh = whh_ref[...]                                            # hoisted
    bh = bh_ref[...]
    h = jnp.zeros((Bp, Hp), jnp.float32)
    hs = []
    for t in range(T):
        emb_t = emb_all[t * Bp:(t + 1) * Bp, :]                   # static slice
        h = jnp.tanh(emb_t
                     + jnp.dot(h, whh, preferred_element_type=jnp.float32)
                     + bh)
        hs.append(h)
    hall = jnp.concatenate(hs, axis=0)                            # (T*Bp, Hp)

    # --- hoisted output projection: one dense MXU matmul over all timesteps ---
    logits = (jnp.dot(hall, whq_ref[...],
                      preferred_element_type=jnp.float32)
              + bq_ref[...])                                      # (T*Bp, Vp)

    # out[b, t*Vp + v] = logits[t*Bp + b, v] — full-sublane, 128-lane-aligned stores.
    for t in range(T):
        out_ref[:, t * Vp:(t + 1) * Vp] = logits[t * Bp:(t + 1) * Bp, :]


@jax.jit
def rnnlm_forward(X, W_xh, W_hh, b_h, W_hq, b_q):
    """X: (batch, num_steps) int32 token ids. Returns (batch, num_steps, vocab) f32."""
    batch, num_steps = X.shape
    vocab, hidden = W_xh.shape

    Bp = _round_up(batch, 8)        # sublane multiple (f32)
    Hp = _round_up(hidden, 128)     # lane multiple
    Vp = _round_up(vocab, 128)      # lane multiple

    f32 = jnp.float32
    # Zero padding keeps the real rows/cols numerically exact: padded hidden
    # units stay tanh(0)=0 and feed zero weights; padded vocab cols are sliced.
    W_xh_p = jnp.zeros((Vp, Hp), f32).at[:vocab, :hidden].set(W_xh.astype(f32))
    W_hh_p = jnp.zeros((Hp, Hp), f32).at[:hidden, :hidden].set(W_hh.astype(f32))
    b_h_p = jnp.zeros((1, Hp), f32).at[0, :hidden].set(b_h.astype(f32))
    W_hq_p = jnp.zeros((Hp, Vp), f32).at[:hidden, :vocab].set(W_hq.astype(f32))
    b_q_p = jnp.zeros((1, Vp), f32).at[0, :vocab].set(b_q.astype(f32))

    # Token ids, time-major, one column; padded batch rows reuse id 0 (their
    # outputs are per-row independent and sliced away).
    ids = jnp.zeros((num_steps, Bp), jnp.int32).at[:, :batch].set(
        X.T.astype(jnp.int32))
    ids_col = ids.reshape(num_steps * Bp, 1)

    out2d = pl.pallas_call(
        rnnlm_kernel,
        out_shape=jax.ShapeDtypeStruct((Bp, num_steps * Vp), jnp.float32),
        in_specs=[
            pl.BlockSpec(memory_space=pltpu.MemorySpace.VMEM),   # token ids
            pl.BlockSpec(memory_space=pltpu.MemorySpace.VMEM),   # W_xh
            pl.BlockSpec(memory_space=pltpu.MemorySpace.VMEM),   # W_hh
            pl.BlockSpec(memory_space=pltpu.MemorySpace.VMEM),   # b_h
            pl.BlockSpec(memory_space=pltpu.MemorySpace.VMEM),   # W_hq
            pl.BlockSpec(memory_space=pltpu.MemorySpace.VMEM),   # b_q
        ],
        out_specs=pl.BlockSpec(memory_space=pltpu.MemorySpace.VMEM),
    )(ids_col, W_xh_p, W_hh_p, b_h_p, W_hq_p, b_q_p)

    # Free reshape (row-major layout already matches) + slice off padding.
    out = out2d.reshape(Bp, num_steps, Vp)[:batch, :, :vocab]
    return out


def rnnlm_reference(X, W_xh, W_hh, b_h, W_hq, b_q):
    """Pure-JAX reference mirroring the PyTorch forward."""
    batch, num_steps = X.shape
    vocab, hidden = W_xh.shape
    embs = jax.nn.one_hot(X.T, vocab, dtype=jnp.float32)
    H = jnp.zeros((batch, hidden), jnp.float32)
    outs = []
    for t in range(num_steps):
        H = jnp.tanh(embs[t] @ W_xh + H @ W_hh + b_h)
        outs.append(H @ W_hq + b_q)
    return jnp.stack(outs, axis=1)


if __name__ == "__main__":
    # Small shapes consistent with the module's forward.
    batch, num_steps = 2, 8
    vocab_size, num_hiddens = 32, 32
    sigma = 0.01

    key = jax.random.PRNGKey(0)
    k_x, k_xh, k_hh, k_hq = jax.random.split(key, 4)

    # Deterministic parameter init (shapes from RNNScratch + RNNLMScratch.init_params).
    W_xh = jax.random.normal(k_xh, (vocab_size, num_hiddens), jnp.float32) * sigma
    W_hh = jax.random.normal(k_hh, (num_hiddens, num_hiddens), jnp.float32) * sigma
    b_h = jnp.zeros((num_hiddens,), jnp.float32)
    W_hq = jax.random.normal(k_hq, (num_hiddens, vocab_size), jnp.float32) * sigma
    b_q = jnp.zeros((vocab_size,), jnp.float32)

    X = jax.random.randint(k_x, (batch, num_steps), 0, vocab_size, jnp.int32)

    out = rnnlm_forward(X, W_xh, W_hh, b_h, W_hq, b_q)
    out = jax.block_until_ready(out)

    ref = rnnlm_reference(X, W_xh, W_hh, b_h, W_hq, b_q)
    assert out.shape == (batch, num_steps, vocab_size)
    assert jnp.allclose(out, ref, atol=1e-5, rtol=1e-5)

    print("KERNEL_OK")
</pallas_src>

<mosaic_0001>
module attributes {stable_mosaic.version = 11 : i64} {
  func.func @rnnlm_kernel(%arg0: memref<64x1xi32, #tpu.memory_space<vmem>>, %arg1: memref<128x128xf32, #tpu.memory_space<vmem>>, %arg2: memref<128x128xf32, #tpu.memory_space<vmem>>, %arg3: memref<1x128xf32, #tpu.memory_space<vmem>>, %arg4: memref<128x128xf32, #tpu.memory_space<vmem>>, %arg5: memref<1x128xf32, #tpu.memory_space<vmem>>, %arg6: memref<8x1024xf32, #tpu.memory_space<vmem>>) attributes {dimension_semantics = [], scalar_prefetch = 0 : i64, scratch_operands = 0 : i64, tpu.core_type = #tpu.core_type<tc>} {
    %c0 = arith.constant 0 : index
    %c0_0 = arith.constant 0 : index
    %0 = vector.load %arg0[%c0, %c0_0] : memref<64x1xi32, #tpu.memory_space<vmem>>, vector<64x1xi32>
    %1 = tpu.iota {dimensions = array<i32: 1>} : vector<64x128xi32>
    %2 = vector.broadcast %0 : vector<64x1xi32> to vector<64x128xi32>
    %3 = arith.cmpi eq, %1, %2 : vector<64x128xi32>
    %4 = arith.extui %3 : vector<64x128xi1> to vector<64x128xi32>
    %5 = arith.sitofp %4 : vector<64x128xi32> to vector<64x128xf32>
    %c0_1 = arith.constant 0 : index
    %c0_2 = arith.constant 0 : index
    %6 = vector.load %arg1[%c0_1, %c0_2] : memref<128x128xf32, #tpu.memory_space<vmem>>, vector<128x128xf32>
    %cst = arith.constant dense<0.000000e+00> : vector<64x128xf32>
    %7 = tpu.matmul %5, %6, %cst {dimension_numbers = #tpu.dot_dimension_numbers<[1], [0], [0], [1], [0, 0, 1, 1], [], []>} : vector<64x128xf32>, vector<128x128xf32>, vector<64x128xf32> -> vector<64x128xf32>
    %c0_3 = arith.constant 0 : index
    %c0_4 = arith.constant 0 : index
    %8 = vector.load %arg2[%c0_3, %c0_4] : memref<128x128xf32, #tpu.memory_space<vmem>>, vector<128x128xf32>
    %c0_5 = arith.constant 0 : index
    %c0_6 = arith.constant 0 : index
    %9 = vector.load %arg3[%c0_5, %c0_6] : memref<1x128xf32, #tpu.memory_space<vmem>>, vector<1x128xf32>
    %cst_7 = arith.constant 0.000000e+00 : f32
    %10 = vector.broadcast %cst_7 : f32 to vector<8x128xf32>
    %11 = vector.extract_strided_slice %7 {offsets = [0, 0], sizes = [8, 128], strides = [1, 1]} : vector<64x128xf32> to vector<8x128xf32>
    %cst_8 = arith.constant dense<0.000000e+00> : vector<8x128xf32>
    %12 = tpu.matmul %10, %8, %cst_8 {dimension_numbers = #tpu.dot_dimension_numbers<[1], [0], [0], [1], [0, 0, 1, 1], [], []>} : vector<8x128xf32>, vector<128x128xf32>, vector<8x128xf32> -> vector<8x128xf32>
    %13 = arith.addf %11, %12 : vector<8x128xf32>
    %14 = vector.broadcast %9 : vector<1x128xf32> to vector<8x128xf32>
    %15 = arith.addf %13, %14 : vector<8x128xf32>
    %16 = math.tanh %15 : vector<8x128xf32>
    %17 = vector.extract_strided_slice %7 {offsets = [8, 0], sizes = [8, 128], strides = [1, 1]} : vector<64x128xf32> to vector<8x128xf32>
    %cst_9 = arith.constant dense<0.000000e+00> : vector<8x128xf32>
    %18 = tpu.matmul %16, %8, %cst_9 {dimension_numbers = #tpu.dot_dimension_numbers<[1], [0], [0], [1], [0, 0, 1, 1], [], []>} : vector<8x128xf32>, vector<128x128xf32>, vector<8x128xf32> -> vector<8x128xf32>
    %19 = arith.addf %17, %18 : vector<8x128xf32>
    %20 = vector.broadcast %9 : vector<1x128xf32> to vector<8x128xf32>
    %21 = arith.addf %19, %20 : vector<8x128xf32>
    %22 = math.tanh %21 : vector<8x128xf32>
    %23 = vector.extract_strided_slice %7 {offsets = [16, 0], sizes = [8, 128], strides = [1, 1]} : vector<64x128xf32> to vector<8x128xf32>
    %cst_10 = arith.constant dense<0.000000e+00> : vector<8x128xf32>
    %24 = tpu.matmul %22, %8, %cst_10 {dimension_numbers = #tpu.dot_dimension_numbers<[1], [0], [0], [1], [0, 0, 1, 1], [], []>} : vector<8x128xf32>, vector<128x128xf32>, vector<8x128xf32> -> vector<8x128xf32>
    %25 = arith.addf %23, %24 : vector<8x128xf32>
    %26 = vector.broadcast %9 : vector<1x128xf32> to vector<8x128xf32>
    %27 = arith.addf %25, %26 : vector<8x128xf32>
    %28 = math.tanh %27 : vector<8x128xf32>
    %29 = vector.extract_strided_slice %7 {offsets = [24, 0], sizes = [8, 128], strides = [1, 1]} : vector<64x128xf32> to vector<8x128xf32>
    %cst_11 = arith.constant dense<0.000000e+00> : vector<8x128xf32>
    %30 = tpu.matmul %28, %8, %cst_11 {dimension_numbers = #tpu.dot_dimension_numbers<[1], [0], [0], [1], [0, 0, 1, 1], [], []>} : vector<8x128xf32>, vector<128x128xf32>, vector<8x128xf32> -> vector<8x128xf32>
    %31 = arith.addf %29, %30 : vector<8x128xf32>
    %32 = vector.broadcast %9 : vector<1x128xf32> to vector<8x128xf32>
    %33 = arith.addf %31, %32 : vector<8x128xf32>
    %34 = math.tanh %33 : vector<8x128xf32>
    %35 = vector.extract_strided_slice %7 {offsets = [32, 0], sizes = [8, 128], strides = [1, 1]} : vector<64x128xf32> to vector<8x128xf32>
    %cst_12 = arith.constant dense<0.000000e+00> : vector<8x128xf32>
    %36 = tpu.matmul %34, %8, %cst_12 {dimension_numbers = #tpu.dot_dimension_numbers<[1], [0], [0], [1], [0, 0, 1, 1], [], []>} : vector<8x128xf32>, vector<128x128xf32>, vector<8x128xf32> -> vector<8x128xf32>
    %37 = arith.addf %35, %36 : vector<8x128xf32>
    %38 = vector.broadcast %9 : vector<1x128xf32> to vector<8x128xf32>
    %39 = arith.addf %37, %38 : vector<8x128xf32>
    %40 = math.tanh %39 : vector<8x128xf32>
    %41 = vector.extract_strided_slice %7 {offsets = [40, 0], sizes = [8, 128], strides = [1, 1]} : vector<64x128xf32> to vector<8x128xf32>
    %cst_13 = arith.constant dense<0.000000e+00> : vector<8x128xf32>
    %42 = tpu.matmul %40, %8, %cst_13 {dimension_numbers = #tpu.dot_dimension_numbers<[1], [0], [0], [1], [0, 0, 1, 1], [], []>} : vector<8x128xf32>, vector<128x128xf32>, vector<8x128xf32> -> vector<8x128xf32>
    %43 = arith.addf %41, %42 : vector<8x128xf32>
    %44 = vector.broadcast %9 : vector<1x128xf32> to vector<8x128xf32>
    %45 = arith.addf %43, %44 : vector<8x128xf32>
    %46 = math.tanh %45 : vector<8x128xf32>
    %47 = vector.extract_strided_slice %7 {offsets = [48, 0], sizes = [8, 128], strides = [1, 1]} : vector<64x128xf32> to vector<8x128xf32>
    %cst_14 = arith.constant dense<0.000000e+00> : vector<8x128xf32>
    %48 = tpu.matmul %46, %8, %cst_14 {dimension_numbers = #tpu.dot_dimension_numbers<[1], [0], [0], [1], [0, 0, 1, 1], [], []>} : vector<8x128xf32>, vector<128x128xf32>, vector<8x128xf32> -> vector<8x128xf32>
    %49 = arith.addf %47, %48 : vector<8x128xf32>
    %50 = vector.broadcast %9 : vector<1x128xf32> to vector<8x128xf32>
    %51 = arith.addf %49, %50 : vector<8x128xf32>
    %52 = math.tanh %51 : vector<8x128xf32>
    %53 = vector.extract_strided_slice %7 {offsets = [56, 0], sizes = [8, 128], strides = [1, 1]} : vector<64x128xf32> to vector<8x128xf32>
    %cst_15 = arith.constant dense<0.000000e+00> : vector<8x128xf32>
    %54 = tpu.matmul %52, %8, %cst_15 {dimension_numbers = #tpu.dot_dimension_numbers<[1], [0], [0], [1], [0, 0, 1, 1], [], []>} : vector<8x128xf32>, vector<128x128xf32>, vector<8x128xf32> -> vector<8x128xf32>
    %55 = arith.addf %53, %54 : vector<8x128xf32>
    %56 = vector.broadcast %9 : vector<1x128xf32> to vector<8x128xf32>
    %57 = arith.addf %55, %56 : vector<8x128xf32>
    %58 = math.tanh %57 : vector<8x128xf32>
    %59 = tpu.concatenate %16, %22, %28, %34, %40, %46, %52, %58 in 0 : vector<8x128xf32>, vector<8x128xf32>, vector<8x128xf32>, vector<8x128xf32>, vector<8x128xf32>, vector<8x128xf32>, vector<8x128xf32>, vector<8x128xf32> -> vector<64x128xf32>
    %c0_16 = arith.constant 0 : index
    %c0_17 = arith.constant 0 : index
    %60 = vector.load %arg4[%c0_16, %c0_17] : memref<128x128xf32, #tpu.memory_space<vmem>>, vector<128x128xf32>
    %cst_18 = arith.constant dense<0.000000e+00> : vector<64x128xf32>
    %61 = tpu.matmul %59, %60, %cst_18 {dimension_numbers = #tpu.dot_dimension_numbers<[1], [0], [0], [1], [0, 0, 1, 1], [], []>} : vector<64x128xf32>, vector<128x128xf32>, vector<64x128xf32> -> vector<64x128xf32>
    %c0_19 = arith.constant 0 : index
    %c0_20 = arith.constant 0 : index
    %62 = vector.load %arg5[%c0_19, %c0_20] : memref<1x128xf32, #tpu.memory_space<vmem>>, vector<1x128xf32>
    %63 = vector.broadcast %62 : vector<1x128xf32> to vector<64x128xf32>
    %64 = arith.addf %61, %63 : vector<64x128xf32>
    %65 = vector.extract_strided_slice %64 {offsets = [0, 0], sizes = [8, 128], strides = [1, 1]} : vector<64x128xf32> to vector<8x128xf32>
    %c0_21 = arith.constant 0 : index
    %c0_22 = arith.constant 0 : index
    %66 = vector.load %arg6[%c0_21, %c0_22] : memref<8x1024xf32, #tpu.memory_space<vmem>>, vector<8x128xf32>
    tpu.vector_store %arg6[%c0_21, %c0_22], %65 {strides = array<i32>} : memref<8x1024xf32, #tpu.memory_space<vmem>>, vector<8x128xf32>,
    %67 = vector.extract_strided_slice %64 {offsets = [8, 0], sizes = [8, 128], strides = [1, 1]} : vector<64x128xf32> to vector<8x128xf32>
    %c0_23 = arith.constant 0 : index
    %c128 = arith.constant 128 : index
    %68 = vector.load %arg6[%c0_23, %c128] : memref<8x1024xf32, #tpu.memory_space<vmem>>, vector<8x128xf32>
    tpu.vector_store %arg6[%c0_23, %c128], %67 {strides = array<i32>} : memref<8x1024xf32, #tpu.memory_space<vmem>>, vector<8x128xf32>,
    %69 = vector.extract_strided_slice %64 {offsets = [16, 0], sizes = [8, 128], strides = [1, 1]} : vector<64x128xf32> to vector<8x128xf32>
    %c0_24 = arith.constant 0 : index
    %c256 = arith.constant 256 : index
    %70 = vector.load %arg6[%c0_24, %c256] : memref<8x1024xf32, #tpu.memory_space<vmem>>, vector<8x128xf32>
    tpu.vector_store %arg6[%c0_24, %c256], %69 {strides = array<i32>} : memref<8x1024xf32, #tpu.memory_space<vmem>>, vector<8x128xf32>,
    %71 = vector.extract_strided_slice %64 {offsets = [24, 0], sizes = [8, 128], strides = [1, 1]} : vector<64x128xf32> to vector<8x128xf32>
    %c0_25 = arith.constant 0 : index
    %c384 = arith.constant 384 : index
    %72 = vector.load %arg6[%c0_25, %c384] : memref<8x1024xf32, #tpu.memory_space<vmem>>, vector<8x128xf32>
    tpu.vector_store %arg6[%c0_25, %c384], %71 {strides = array<i32>} : memref<8x1024xf32, #tpu.memory_space<vmem>>, vector<8x128xf32>,
    %73 = vector.extract_strided_slice %64 {offsets = [32, 0], sizes = [8, 128], strides = [1, 1]} : vector<64x128xf32> to vector<8x128xf32>
    %c0_26 = arith.constant 0 : index
    %c512 = arith.constant 512 : index
    %74 = vector.load %arg6[%c0_26, %c512] : memref<8x1024xf32, #tpu.memory_space<vmem>>, vector<8x128xf32>
    tpu.vector_store %arg6[%c0_26, %c512], %73 {strides = array<i32>} : memref<8x1024xf32, #tpu.memory_space<vmem>>, vector<8x128xf32>,
    %75 = vector.extract_strided_slice %64 {offsets = [40, 0], sizes = [8, 128], strides = [1, 1]} : vector<64x128xf32> to vector<8x128xf32>
    %c0_27 = arith.constant 0 : index
    %c640 = arith.constant 640 : index
    %76 = vector.load %arg6[%c0_27, %c640] : memref<8x1024xf32, #tpu.memory_space<vmem>>, vector<8x128xf32>
    tpu.vector_store %arg6[%c0_27, %c640], %75 {strides = array<i32>} : memref<8x1024xf32, #tpu.memory_space<vmem>>, vector<8x128xf32>,
    %77 = vector.extract_strided_slice %64 {offsets = [48, 0], sizes = [8, 128], strides = [1, 1]} : vector<64x128xf32> to vector<8x128xf32>
    %c0_28 = arith.constant 0 : index
    %c768 = arith.constant 768 : index
    %78 = vector.load %arg6[%c0_28, %c768] : memref<8x1024xf32, #tpu.memory_space<vmem>>, vector<8x128xf32>
    tpu.vector_store %arg6[%c0_28, %c768], %77 {strides = array<i32>} : memref<8x1024xf32, #tpu.memory_space<vmem>>, vector<8x128xf32>,
    %79 = vector.extract_strided_slice %64 {offsets = [56, 0], sizes = [8, 128], strides = [1, 1]} : vector<64x128xf32> to vector<8x128xf32>
    %c0_29 = arith.constant 0 : index
    %c896 = arith.constant 896 : index
    %80 = vector.load %arg6[%c0_29, %c896] : memref<8x1024xf32, #tpu.memory_space<vmem>>, vector<8x128xf32>
    tpu.vector_store %arg6[%c0_29, %c896], %79 {strides = array<i32>} : memref<8x1024xf32, #tpu.memory_space<vmem>>, vector<8x128xf32>,
    return
  }
}

</mosaic_0001>

<bundles_post_ra>
// kernel: rnnlm_forward.1
= control target key start
LH: loop header
LB: loop body
LE: loop exit
PB: predicated region body
PF: predicated region fallthrough
CT: control target
= control target key end

     0   :  { %v1541_v0 = vmov 0   ;;  %v1542_v6 = vmov 0.0   ;;  %vm1543_vm0 = vmmov 0   ;;  %v31_v42 = vlaneseq  ;;  %s2128_s0 = inlined_call_operand.vmem [shape: s32[64,1], index: 0, kind: input, shape index: {}]   ;;  %s2129_s1 = inlined_call_operand.vmem [shape: f32[128,128], index: 1, kind: input, shape index: {}]   ;;  %s2130_s2 = inlined_call_operand.vmem [shape: f32[128,128], index: 2, kind: input, shape index: {}]   ;;  %s2131_s3 = inlined_call_operand.vmem [shape: f32[1,128], index: 3, kind: input, shape index: {}]   ;;  %s2132_s4 = inlined_call_operand.vmem [shape: f32[128,128], index: 4, kind: input, shape index: {}]   ;;  %s2133_s5 = inlined_call_operand.vmem [shape: f32[1,128], index: 5, kind: input, shape index: {}]   ;;  %s2134_s6 = inlined_call_operand.vmem [shape: f32[8,1024], index: 6, kind: output, shape index: {}]  }
   0x1   :  { %1523 = vset.pattern.permute.xlu0 %v1541_v0  ;;  %v23_v1 = vld [vmem:[%s2128_s0] sm:$0xff]  ;;  %1524 = vset.pattern.permute.xlu1 %v1541_v0  ;;  %v25_v2 = vld [vmem:[%s2128_s0 + $0x10] sm:$0xff]  ;;  %v24_v3 = vld [vmem:[%s2128_s0 + $0x8] sm:$0xff]  ;;  %v1544_v46 = vmov 1.0  }
   0x2   :  { %34 = vperm.xlu0 %1523, %v23_v1   ;;  %40 = vperm.xlu1 %1524, %v25_v2   ;;  %v26_v4 = vld [vmem:[%s2128_s0 + $0x18] sm:$0xff]  ;;  %v95_v8 = vld [vmem:[%s2129_s1 + $0x70] sm:$0xff]  ;;  %v94_v10 = vld [vmem:[%s2129_s1 + $0x68] sm:$0xff]  ;;  %v32_v43 = vand.u32 127, %v31_v42 }
   0x3   :  { %v96_v5 = vld [vmem:[%s2129_s1 + $0x78] sm:$0xff]  ;;  %1195 = vmatprep.subr.mxu1 %v1542_v6  ;;  %1227 = vmatprep.mubr.msk.f32.mxu1 %vm1543_vm0, %v1542_v6  ;;  %v1610_v9 = vld [vmem:[%s2130_s2 + $0x70] sm:$0xff]  ;;  %v1619_v11 = vld [vmem:[%s2130_s2 + $0x68] sm:$0xff] }
   0x4   :  { %v1599_v7 = vld [vmem:[%s2130_s2 + $0x78] sm:$0xff]  ;;  %1151 = vmatprep.subr.mxu0 %v96_v5  ;;  %v27_v12 = vld [vmem:[%s2128_s0 + $0x20] sm:$0xff]  ;;  %v28_v13 = vld [vmem:[%s2128_s0 + $0x28] sm:$0xff] }
   0x5   :  { %1196 = vmatpush3.msra.mxu1 %v1599_v7  ;;  %1152 = vmatpush3.msra.mxu0 %v96_v5  ;;  %v93_v14 = vld [vmem:[%s2129_s1 + $0x60] sm:$0xff]  ;;  %v29_v16 = vld [vmem:[%s2128_s0 + $0x30] sm:$0xff]  ;;  %v92_v17 = vld [vmem:[%s2129_s1 + $0x58] sm:$0xff] }
   0x6   :  { %1197 = vmatprep.subr.mxu1 %v1542_v6  ;;  %37 = vperm.xlu0 %1523, %v24_v3   ;;  %v1636_v15 = vld [vmem:[%s2130_s2 + $0x60] sm:$0xff]  ;;  %v1649_v18 = vld [vmem:[%s2130_s2 + $0x58] sm:$0xff]  ;;  %v91_v19 = vld [vmem:[%s2129_s1 + $0x50] sm:$0xff] }
   0x7   :  { %43 = vperm.xlu1 %1524, %v26_v4   ;;  %1153 = vmatprep.subr.mxu0 %v95_v8  ;;  %v1658_v20 = vld [vmem:[%s2130_s2 + $0x50] sm:$0xff]  ;;  %v90_v21 = vld [vmem:[%s2129_s1 + $0x48] sm:$0xff]  ;;  %v89_v23 = vld [vmem:[%s2129_s1 + $0x40] sm:$0xff] }
   0x8   :  { %1198 = vmatpush3.msra.mxu1 %v1610_v9  ;;  %1154 = vmatpush3.msra.mxu0 %v95_v8  ;;  %v1668_v22 = vld [vmem:[%s2130_s2 + $0x48] sm:$0xff]  ;;  %v1678_v24 = vld [vmem:[%s2130_s2 + $0x40] sm:$0xff]  ;;  %v88_v25 = vld [vmem:[%s2129_s1 + $0x38] sm:$0xff] }
   0x9   :  { %1199 = vmatprep.subr.mxu1 %v1542_v6  ;;  %1155 = vmatprep.subr.mxu0 %v94_v10  ;;  %v1688_v26 = vld [vmem:[%s2130_s2 + $0x38] sm:$0xff]  ;;  %v87_v27 = vld [vmem:[%s2129_s1 + $0x30] sm:$0xff]  ;;  %v86_v29 = vld [vmem:[%s2129_s1 + $0x28] sm:$0xff] }
   0xa   :  { %1200 = vmatpush3.msra.mxu1 %v1619_v11  ;;  %46 = vperm.xlu0 %1523, %v27_v12   ;;  %v1698_v28 = vld [vmem:[%s2130_s2 + $0x30] sm:$0xff]  ;;  %v1708_v30 = vld [vmem:[%s2130_s2 + $0x28] sm:$0xff]  ;;  %v85_v31 = vld [vmem:[%s2129_s1 + $0x20] sm:$0xff] }
   0xb   :  { %49 = vperm.xlu1 %1524, %v28_v13   ;;  %1156 = vmatpush3.msra.mxu0 %v94_v10  ;;  %v1718_v32 = vld [vmem:[%s2130_s2 + $0x20] sm:$0xff]  ;;  %v84_v33 = vld [vmem:[%s2129_s1 + $0x18] sm:$0xff]  ;;  %v83_v35 = vld [vmem:[%s2129_s1 + $0x10] sm:$0xff] }
   0xc   :  { %1201 = vmatprep.subr.mxu1 %v1542_v6  ;;  %1157 = vmatprep.subr.mxu0 %v93_v14  ;;  %v1728_v34 = vld [vmem:[%s2130_s2 + $0x18] sm:$0xff]  ;;  %v1738_v36 = vld [vmem:[%s2130_s2 + $0x10] sm:$0xff]  ;;  %v82_v37 = vld [vmem:[%s2129_s1 + $0x8] sm:$0xff] }
   0xd   :  { %1202 = vmatpush3.msra.mxu1 %v1636_v15  ;;  %1158 = vmatpush3.msra.mxu0 %v93_v14  ;;  %v1748_v38 = vld [vmem:[%s2130_s2 + $0x8] sm:$0xff]  ;;  %v81_v39 = vld [vmem:[%s2129_s1] sm:$0xff]  ;;  %v30_v41 = vld [vmem:[%s2128_s0 + $0x38] sm:$0xff] }
   0xe   :  { %1203 = vmatprep.subr.mxu1 %v1542_v6  ;;  %52 = vperm.xlu0 %1523, %v29_v16   ;;  %v1758_v40 = vld [vmem:[%s2130_s2] sm:$0xff]  ;;  %v810_v42 = vld [vmem:[%s2132_s4 + $0x8] sm:$0xff] }
   0xf   :  { %1159 = vmatprep.subr.mxu0 %v92_v17  ;;  %1204 = vmatpush3.msra.mxu1 %v1649_v18  ;;  %v1840_v57 = vld [vmem:[%s2131_s3] ss:$0 sm:$0xff] }
  0x10   :  { %1160 = vmatpush3.msra.mxu0 %v92_v17  ;;  %1205 = vmatprep.subr.mxu1 %v1542_v6 }
  0x11   :  { %1161 = vmatprep.subr.mxu0 %v91_v19  ;;  %1206 = vmatpush3.msra.mxu1 %v1658_v20 }
  0x12   :  { %1162 = vmatpush3.msra.mxu0 %v91_v19  ;;  %1207 = vmatprep.subr.mxu1 %v1542_v6 }
  0x13   :  { %1163 = vmatprep.subr.mxu0 %v90_v21  ;;  %1208 = vmatpush3.msra.mxu1 %v1668_v22 }
  0x14   :  { %1164 = vmatpush3.msra.mxu0 %v90_v21  ;;  %1209 = vmatprep.subr.mxu1 %v1542_v6 }
  0x15   :  { %1165 = vmatprep.subr.mxu0 %v89_v23  ;;  %1210 = vmatpush3.msra.mxu1 %v1678_v24 }
  0x16   :  { %1166 = vmatpush3.msra.mxu0 %v89_v23  ;;  %1211 = vmatprep.subr.mxu1 %v1542_v6 }
  0x17   :  { %1167 = vmatprep.subr.mxu0 %v88_v25  ;;  %1212 = vmatpush3.msra.mxu1 %v1688_v26 }
  0x18   :  { %1168 = vmatpush3.msra.mxu0 %v88_v25  ;;  %1213 = vmatprep.subr.mxu1 %v1542_v6 }
  0x19   :  { %1169 = vmatprep.subr.mxu0 %v87_v27  ;;  %1214 = vmatpush3.msra.mxu1 %v1698_v28 }
  0x1a   :  { %1170 = vmatpush3.msra.mxu0 %v87_v27  ;;  %1215 = vmatprep.subr.mxu1 %v1542_v6 }
  0x1b   :  { %1171 = vmatprep.subr.mxu0 %v86_v29  ;;  %1216 = vmatpush3.msra.mxu1 %v1708_v30 }
  0x1c   :  { %1172 = vmatpush3.msra.mxu0 %v86_v29  ;;  %1217 = vmatprep.subr.mxu1 %v1542_v6 }
  0x1d   :  { %1173 = vmatprep.subr.mxu0 %v85_v31  ;;  %1218 = vmatpush3.msra.mxu1 %v1718_v32 }
  0x1e   :  { %1174 = vmatpush3.msra.mxu0 %v85_v31  ;;  %1219 = vmatprep.subr.mxu1 %v1542_v6 }
  0x1f   :  { %1175 = vmatprep.subr.mxu0 %v84_v33  ;;  %1220 = vmatpush3.msra.mxu1 %v1728_v34 }
  0x20   :  { %1176 = vmatpush3.msra.mxu0 %v84_v33  ;;  %1221 = vmatprep.subr.mxu1 %v1542_v6 }
  0x21   :  { %1177 = vmatprep.subr.mxu0 %v83_v35  ;;  %1222 = vmatpush3.msra.mxu1 %v1738_v36 }
  0x22   :  { %1178 = vmatpush3.msra.mxu0 %v83_v35  ;;  %1223 = vmatprep.subr.mxu1 %v1542_v6 }
  0x23   :  { %1179 = vmatprep.subr.mxu0 %v82_v37  ;;  %1224 = vmatpush3.msra.mxu1 %v1748_v38 }
  0x24   :  { %1180 = vmatpush3.msra.mxu0 %v82_v37  ;;  %1225 = vmatprep.subr.mxu1 %v1542_v6 }
  0x25   :  { %1181 = vmatprep.subr.mxu0 %v81_v39  ;;  %1226 = vmatpush3.msra.mxu1 %v1758_v40 }
  0x26   :  { %1182 = vmatpush3.msra.mxu0 %v81_v39  ;;  %1228 = vmatmul.mubr.f32.vlgmr.msra.gmra.mxu1 %v1542_v6  ;;  %v813_v39 = vld [vmem:[%s2132_s4 + $0x20] sm:$0xff] }
  0x27   :  { %55 = vperm.xlu1 %1524, %v30_v41   ;;  %1230 = vmatprep.subr.mxu0 %v1542_v6  ;;  %v811_v41 = vld [vmem:[%s2132_s4 + $0x10] sm:$0xff] }
  0x28   :  { %1265 = vmatprep.subr.mxu1 %v1542_v6  ;;  %1297 = vmatprep.mubr.msk.f32.mxu1 %vm1543_vm0, %v1542_v6 }
  0x29   :  { %1266 = vmatpush3.msra.mxu1 %v1599_v7 }
  0x2a   :  { %1267 = vmatprep.subr.mxu1 %v1542_v6 }
  0x2b   :  { %1268 = vmatpush3.msra.mxu1 %v1610_v9 }
  0x2c   :  { %1269 = vmatprep.subr.mxu1 %v1542_v6 }
  0x2d   :  { %1270 = vmatpush3.msra.mxu1 %v1619_v11 }
  0x2e   :  { %1271 = vmatprep.subr.mxu1 %v1542_v6 }
  0x2f   :  { %1272 = vmatpush3.msra.mxu1 %v1636_v15 }
  0x30   :  { %1273 = vmatprep.subr.mxu1 %v1542_v6 }
  0x31   :  { %1274 = vmatpush3.msra.mxu1 %v1649_v18 }
  0x32   :  { %1275 = vmatprep.subr.mxu1 %v1542_v6 }
  0x33   :  { %1276 = vmatpush3.msra.mxu1 %v1658_v20 }
  0x34   :  { %1277 = vmatprep.subr.mxu1 %v1542_v6 }
  0x35   :  { %1278 = vmatpush3.msra.mxu1 %v1668_v22 }
  0x36   :  { %1279 = vmatprep.subr.mxu1 %v1542_v6 }
  0x37   :  { %1280 = vmatpush3.msra.mxu1 %v1678_v24 }
  0x38   :  { %1281 = vmatprep.subr.mxu1 %v1542_v6 }
  0x39   :  { %1282 = vmatpush3.msra.mxu1 %v1688_v26 }
  0x3a   :  { %1283 = vmatprep.subr.mxu1 %v1542_v6 }
  0x3b   :  { %1284 = vmatpush3.msra.mxu1 %v1698_v28 }
  0x3c   :  { %1285 = vmatprep.subr.mxu1 %v1542_v6 }
  0x3d   :  { %1286 = vmatpush3.msra.mxu1 %v1708_v30 }
  0x3e   :  { %1287 = vmatprep.subr.mxu1 %v1542_v6 }
  0x3f   :  { %1288 = vmatpush3.msra.mxu1 %v1718_v32 }
  0x40   :  { %1289 = vmatprep.subr.mxu1 %v1542_v6 }
  0x41   :  { %1290 = vmatpush3.msra.mxu1 %v1728_v34 }
  0x42   :  { %1291 = vmatprep.subr.mxu1 %v1542_v6 }
  0x43   :  { %1292 = vmatpush3.msra.mxu1 %v1738_v36 }
  0x44   :  { %1293 = vmatprep.subr.mxu1 %v1542_v6 }
  0x45   :  { %1294 = vmatpush3.msra.mxu1 %v1748_v38 }
  0x46   :  { %1295 = vmatprep.subr.mxu1 %v1542_v6 }
  0x47   :  { %1296 = vmatpush3.msra.mxu1 %v1758_v40 }
  0x48   :  { %1335 = vmatprep.subr.mxu1 %v1542_v6 }
  0x7d   :  { %v35_v44 = vpop.permute.xlu0 %34  ;;  %v41_v45 = vpop.permute.xlu1 %40 }
  0x7e   :  { %vm57_vm1 = vcmp.eq.s32.totalorder %v32_v43, %v35_v44  ;;  %vm59_vm2 = vcmp.eq.s32.totalorder %v32_v43, %v41_v45 }
  0x7f   :  { %1183 = vmatprep.mubr.msk.f32.mxu0 %vm57_vm1, %v1544_v46 }
  0x81   :  { %v38_v47 = vpop.permute.xlu0 %37 }
  0x82   :  { %v44_v48 = vpop.permute.xlu1 %43  ;;  %vm58_vm3 = vcmp.eq.s32.totalorder %v32_v43, %v38_v47 }
  0x83   :  { %1184 = vmatmul.mubr.msk.f32.vlgmr.msra.gmra.mxu0 %vm58_vm3, %v1544_v46  ;;  %vm60_vm4 = vcmp.eq.s32.totalorder %v32_v43, %v44_v48 }
  0x84   :  { %1186 = vmatprep.mubr.msk.f32.mxu0 %vm59_vm2, %v1544_v46  ;;  %1231 = vmatpush3.msra.mxu0 %v1599_v7 }
  0x85   :  { %v47_v49 = vpop.permute.xlu0 %46  ;;  %1232 = vmatprep.subr.mxu0 %v1542_v6 }
  0x86   :  { %v50_v50 = vpop.permute.xlu1 %49  ;;  %vm61_vm5 = vcmp.eq.s32.totalorder %v32_v43, %v47_v49  ;;  %1233 = vmatpush3.msra.mxu0 %v1610_v9  ;;  %v966_v49 = vld [vmem:[%s2133_s5] ss:$0 sm:$0xff] }
  0x87   :  { %1187 = vmatmul.mubr.msk.f32.gmra.mxu0 %vm60_vm4, %v1544_v46  ;;  %1234 = vmatprep.subr.mxu0 %v1542_v6  ;;  %vm62_vm6 = vcmp.eq.s32.totalorder %v32_v43, %v50_v50 }
  0x88   :  { %1189 = vmatprep.mubr.msk.f32.mxu0 %vm61_vm5, %v1544_v46  ;;  %1235 = vmatpush3.msra.mxu0 %v1619_v11 }
  0x89   :  { %v53_v51 = vpop.permute.xlu0 %52  ;;  %1236 = vmatprep.subr.mxu0 %v1542_v6 }
  0x8a   :  { %vm63_vm7 = vcmp.eq.s32.totalorder %v32_v43, %v53_v51  ;;  %1237 = vmatpush3.msra.mxu0 %v1636_v15 }
  0x8b   :  { %1190 = vmatmul.mubr.msk.f32.gmra.mxu0 %vm62_vm6, %v1544_v46  ;;  %1238 = vmatprep.subr.mxu0 %v1542_v6 }
  0x8c   :  { %1192 = vmatprep.mubr.msk.f32.mxu0 %vm63_vm7, %v1544_v46  ;;  %1239 = vmatpush3.msra.mxu0 %v1649_v18 }
  0x8d   :  { %1240 = vmatprep.subr.mxu0 %v1542_v6 }
  0x8e   :  { %1241 = vmatpush3.msra.mxu0 %v1658_v20 }
  0x8f   :  { %1242 = vmatprep.subr.mxu0 %v1542_v6 }
  0x90   :  { %1243 = vmatpush3.msra.mxu0 %v1668_v22 }
  0x91   :  { %1244 = vmatprep.subr.mxu0 %v1542_v6 }
  0x92   :  { %1245 = vmatpush3.msra.mxu0 %v1678_v24 }
  0x93   :  { %1246 = vmatprep.subr.mxu0 %v1542_v6 }
  0x94   :  { %1247 = vmatpush3.msra.mxu0 %v1688_v26 }
  0x95   :  { %1248 = vmatprep.subr.mxu0 %v1542_v6 }
  0x96   :  { %1249 = vmatpush3.msra.mxu0 %v1698_v28 }
  0x97   :  { %1250 = vmatprep.subr.mxu0 %v1542_v6 }
  0x98   :  { %1251 = vmatpush3.msra.mxu0 %v1708_v30 }
  0x99   :  { %1252 = vmatprep.subr.mxu0 %v1542_v6 }
  0x9a   :  { %1253 = vmatpush3.msra.mxu0 %v1718_v32 }
  0x9b   :  { %1254 = vmatprep.subr.mxu0 %v1542_v6 }
  0x9c   :  { %1255 = vmatpush3.msra.mxu0 %v1728_v34 }
  0x9d   :  { %1256 = vmatprep.subr.mxu0 %v1542_v6 }
  0x9e   :  { %1257 = vmatpush3.msra.mxu0 %v1738_v36 }
  0x9f   :  { %1258 = vmatprep.subr.mxu0 %v1542_v6 }
  0xa0   :  { %1259 = vmatpush3.msra.mxu0 %v1748_v38 }
  0xa1   :  { %1260 = vmatprep.subr.mxu0 %v1542_v6 }
  0xa2   :  { %1261 = vmatpush3.msra.mxu0 %v1758_v40  ;;  %v56_v52 = vpop.permute.xlu1 %55 }
  0xa3   :  { %1300 = vmatprep.subr.mxu0 %v1542_v6  ;;  %vm64_vm8 = vcmp.eq.s32.totalorder %v32_v43, %v56_v52  ;;  %v809_v43 = vld [vmem:[%s2132_s4] sm:$0xff] }
  0xa4   :  { %1193 = vmatmul.mubr.msk.f32.gmra.mxu0 %vm64_vm8, %v1544_v46 }
  0xa5   :  { %1262 = vmatprep.mubr.msk.f32.mxu0 %vm1543_vm0, %v1542_v6 }
  0xe6   :  { %v285_v53 = vpop.f32.mrf.mxu1 }
  0xe8   :  { %v1229_v54 = vpop.f32.mrf.mxu1 }
 0x143   :  { %v1185_v55 = vpop.f32.mrf.mxu0 }
 0x145   :  { %v163_v56 = vpop.f32.mrf.mxu0 }
 0x146   :  { %v289_v58 = vadd.f32 %v285_v53, %v163_v56 }
 0x147   :  { %v1880_v61 = vpop.f32.mrf.mxu0 }
 0x148   :  { %v296_v59 = vadd.f32 %v1840_v57, %v289_v58 }
 0x149   :  { %v173_v62 = vpop.f32.mrf.mxu0 }
 0x14a   :  { %1525 = vtanh.f32 %v296_v59 }
 0x14b   :  { %v1882_v63 = vpop.f32.mrf.mxu0 }
 0x14d   :  { %v1884_v0 = vpop.f32.mrf.mxu0 }
 0x157   :  { %v1843_v60 = vpop.eup %1525 }
 0x158   :  { %1263 = vmatmul.mubr.f32.vlgmr.msra.gmra.mxu0 %v1843_v60 }
 0x159   :  { %1301 = vmatpush3.msra.mxu0 %v1599_v7  ;;  %1332 = vmatprep.mubr.msk.f32.mxu0 %vm1543_vm0, %v1542_v6 }
 0x15a   :  { %1302 = vmatprep.subr.mxu0 %v1542_v6 }
 0x15b   :  { %1303 = vmatpush3.msra.mxu0 %v1610_v9 }
 0x15c   :  { %1304 = vmatprep.subr.mxu0 %v1542_v6 }
 0x15d   :  { %1305 = vmatpush3.msra.mxu0 %v1619_v11 }
 0x15e   :  { %1306 = vmatprep.subr.mxu0 %v1542_v6 }
 0x15f   :  { %1307 = vmatpush3.msra.mxu0 %v1636_v15 }
 0x160   :  { %1308 = vmatprep.subr.mxu0 %v1542_v6 }
 0x161   :  { %1309 = vmatpush3.msra.mxu0 %v1649_v18 }
 0x162   :  { %1310 = vmatprep.subr.mxu0 %v1542_v6 }
 0x163   :  { %1311 = vmatpush3.msra.mxu0 %v1658_v20 }
 0x164   :  { %1312 = vmatprep.subr.mxu0 %v1542_v6  ;;  %v1886_v1 = vpop.f32.mrf.mxu0 }
 0x165   :  { %1313 = vmatpush3.msra.mxu0 %v1668_v22 }
 0x166   :  { %1314 = vmatprep.subr.mxu0 %v1542_v6  ;;  %v1888_v2 = vpop.f32.mrf.mxu0 }
 0x167   :  { %1315 = vmatpush3.msra.mxu0 %v1678_v24 }
 0x168   :  { %1316 = vmatprep.subr.mxu0 %v1542_v6 }
 0x169   :  { %1317 = vmatpush3.msra.mxu0 %v1688_v26 }
 0x16a   :  { %1318 = vmatprep.subr.mxu0 %v1542_v6 }
 0x16b   :  { %1319 = vmatpush3.msra.mxu0 %v1698_v28 }
 0x16c   :  { %1320 = vmatprep.subr.mxu0 %v1542_v6 }
 0x16d   :  { %1321 = vmatpush3.msra.mxu0 %v1708_v30 }
 0x16e   :  { %1322 = vmatprep.subr.mxu0 %v1542_v6 }
 0x16f   :  { %1323 = vmatpush3.msra.mxu0 %v1718_v32 }
 0x170   :  { %1324 = vmatprep.subr.mxu0 %v1542_v6 }
 0x171   :  { %1325 = vmatpush3.msra.mxu0 %v1728_v34 }
 0x172   :  { %1326 = vmatprep.subr.mxu0 %v1542_v6 }
 0x173   :  { %1327 = vmatpush3.msra.mxu0 %v1738_v36 }
 0x174   :  { %1328 = vmatprep.subr.mxu0 %v1542_v6 }
 0x175   :  { %1329 = vmatpush3.msra.mxu0 %v1748_v38 }
 0x176   :  { %1330 = vmatprep.subr.mxu0 %v1542_v6 }
 0x177   :  { %1331 = vmatpush3.msra.mxu0 %v1758_v40 }
 0x178   :  { %1370 = vmatprep.subr.mxu0 %v1542_v6 }
 0x218   :  { %v364_v3 = vpop.f32.mrf.mxu0 }
 0x219   :  { %v368_v4 = vadd.f32 %v1185_v55, %v364_v3 }
 0x21a   :  { %v1264_v5 = vpop.f32.mrf.mxu0 }
 0x21b   :  { %v369_v8 = vadd.f32 %v1840_v57, %v368_v4 }
 0x21d   :  { %1527 = vtanh.f32 %v369_v8 }
 0x22a   :  { %v1891_v10 = vpop.eup %1527 }
 0x22b   :  { %1298 = vmatmul.mubr.f32.vlgmr.msra.gmra.mxu1 %v1891_v10 }
 0x22c   :  { %1336 = vmatpush3.msra.mxu1 %v1599_v7  ;;  %1367 = vmatprep.mubr.msk.f32.mxu1 %vm1543_vm0, %v1542_v6 }
 0x22d   :  { %1337 = vmatprep.subr.mxu1 %v1542_v6 }
 0x22e   :  { %1338 = vmatpush3.msra.mxu1 %v1610_v9 }
 0x22f   :  { %1339 = vmatprep.subr.mxu1 %v1542_v6 }
 0x230   :  { %1340 = vmatpush3.msra.mxu1 %v1619_v11 }
 0x231   :  { %1341 = vmatprep.subr.mxu1 %v1542_v6 }
 0x232   :  { %1342 = vmatpush3.msra.mxu1 %v1636_v15 }
 0x233   :  { %1343 = vmatprep.subr.mxu1 %v1542_v6 }
 0x234   :  { %1344 = vmatpush3.msra.mxu1 %v1649_v18 }
 0x235   :  { %1345 = vmatprep.subr.mxu1 %v1542_v6 }
 0x236   :  { %1346 = vmatpush3.msra.mxu1 %v1658_v20 }
 0x237   :  { %1347 = vmatprep.subr.mxu1 %v1542_v6 }
 0x238   :  { %1348 = vmatpush3.msra.mxu1 %v1668_v22 }
 0x239   :  { %1349 = vmatprep.subr.mxu1 %v1542_v6 }
 0x23a   :  { %1350 = vmatpush3.msra.mxu1 %v1678_v24 }
 0x23b   :  { %1351 = vmatprep.subr.mxu1 %v1542_v6 }
 0x23c   :  { %1352 = vmatpush3.msra.mxu1 %v1688_v26 }
 0x23d   :  { %1353 = vmatprep.subr.mxu1 %v1542_v6 }
 0x23e   :  { %1354 = vmatpush3.msra.mxu1 %v1698_v28 }
 0x23f   :  { %1355 = vmatprep.subr.mxu1 %v1542_v6 }
 0x240   :  { %1356 = vmatpush3.msra.mxu1 %v1708_v30 }
 0x241   :  { %1357 = vmatprep.subr.mxu1 %v1542_v6 }
 0x242   :  { %1358 = vmatpush3.msra.mxu1 %v1718_v32 }
 0x243   :  { %1359 = vmatprep.subr.mxu1 %v1542_v6 }
 0x244   :  { %1360 = vmatpush3.msra.mxu1 %v1728_v34 }
 0x245   :  { %1361 = vmatprep.subr.mxu1 %v1542_v6 }
 0x246   :  { %1362 = vmatpush3.msra.mxu1 %v1738_v36 }
 0x247   :  { %1363 = vmatprep.subr.mxu1 %v1542_v6 }
 0x248   :  { %1364 = vmatpush3.msra.mxu1 %v1748_v38 }
 0x249   :  { %1365 = vmatprep.subr.mxu1 %v1542_v6 }
 0x24a   :  { %1366 = vmatpush3.msra.mxu1 %v1758_v40 }
 0x24b   :  { %1405 = vmatprep.subr.mxu1 %v1542_v6 }
 0x2eb   :  { %v437_v12 = vpop.f32.mrf.mxu1 }
 0x2ec   :  { %v441_v13 = vadd.f32 %v437_v12, %v173_v62 }
 0x2ed   :  { %v1299_v14 = vpop.f32.mrf.mxu1 }
 0x2ee   :  { %v442_v16 = vadd.f32 %v1840_v57, %v441_v13 }
 0x2f0   :  { %1529 = vtanh.f32 %v442_v16 }
 0x2fd   :  { %v1929_v17 = vpop.eup %1529 }
 0x2fe   :  { %1333 = vmatmul.mubr.f32.vlgmr.msra.gmra.mxu0 %v1929_v17 }
 0x2ff   :  { %1371 = vmatpush3.msra.mxu0 %v1599_v7  ;;  %1402 = vmatprep.mubr.msk.f32.mxu0 %vm1543_vm0, %v1542_v6 }
 0x300   :  { %1372 = vmatprep.subr.mxu0 %v1542_v6 }
 0x301   :  { %1373 = vmatpush3.msra.mxu0 %v1610_v9 }
 0x302   :  { %1374 = vmatprep.subr.mxu0 %v1542_v6 }
 0x303   :  { %1375 = vmatpush3.msra.mxu0 %v1619_v11 }
 0x304   :  { %1376 = vmatprep.subr.mxu0 %v1542_v6 }
 0x305   :  { %1377 = vmatpush3.msra.mxu0 %v1636_v15 }
 0x306   :  { %1378 = vmatprep.subr.mxu0 %v1542_v6 }
 0x307   :  { %1379 = vmatpush3.msra.mxu0 %v1649_v18 }
 0x308   :  { %1380 = vmatprep.subr.mxu0 %v1542_v6 }
 0x309   :  { %1381 = vmatpush3.msra.mxu0 %v1658_v20 }
 0x30a   :  { %1382 = vmatprep.subr.mxu0 %v1542_v6 }
 0x30b   :  { %1383 = vmatpush3.msra.mxu0 %v1668_v22 }
 0x30c   :  { %1384 = vmatprep.subr.mxu0 %v1542_v6 }
 0x30d   :  { %1385 = vmatpush3.msra.mxu0 %v1678_v24 }
 0x30e   :  { %1386 = vmatprep.subr.mxu0 %v1542_v6 }
 0x30f   :  { %1387 = vmatpush3.msra.mxu0 %v1688_v26 }
 0x310   :  { %1388 = vmatprep.subr.mxu0 %v1542_v6 }
 0x311   :  { %1389 = vmatpush3.msra.mxu0 %v1698_v28 }
 0x312   :  { %1390 = vmatprep.subr.mxu0 %v1542_v6 }
 0x313   :  { %1391 = vmatpush3.msra.mxu0 %v1708_v30 }
 0x314   :  { %1392 = vmatprep.subr.mxu0 %v1542_v6 }
 0x315   :  { %1393 = vmatpush3.msra.mxu0 %v1718_v32 }
 0x316   :  { %1394 = vmatprep.subr.mxu0 %v1542_v6 }
 0x317   :  { %1395 = vmatpush3.msra.mxu0 %v1728_v34 }
 0x318   :  { %1396 = vmatprep.subr.mxu0 %v1542_v6 }
 0x319   :  { %1397 = vmatpush3.msra.mxu0 %v1738_v36 }
 0x31a   :  { %1398 = vmatprep.subr.mxu0 %v1542_v6 }
 0x31b   :  { %1399 = vmatpush3.msra.mxu0 %v1748_v38 }
 0x31c   :  { %1400 = vmatprep.subr.mxu0 %v1542_v6 }
 0x31d   :  { %1401 = vmatpush3.msra.mxu0 %v1758_v40 }
 0x31e   :  { %1440 = vmatprep.subr.mxu0 %v1542_v6 }
 0x3be   :  { %v510_v19 = vpop.f32.mrf.mxu0 }
 0x3bf   :  { %v514_v21 = vadd.f32 %v1880_v61, %v510_v19 }
 0x3c0   :  { %v1334_v23 = vpop.f32.mrf.mxu0 }
 0x3c1   :  { %v515_v25 = vadd.f32 %v1840_v57, %v514_v21 }
 0x3c3   :  { %1531 = vtanh.f32 %v515_v25 }
 0x3d0   :  { %v1968_v27 = vpop.eup %1531 }
 0x3d1   :  { %1368 = vmatmul.mubr.f32.vlgmr.msra.gmra.mxu1 %v1968_v27 }
 0x3d2   :  { %1406 = vmatpush3.msra.mxu1 %v1599_v7  ;;  %1437 = vmatprep.mubr.msk.f32.mxu1 %vm1543_vm0, %v1542_v6 }
 0x3d3   :  { %1407 = vmatprep.subr.mxu1 %v1542_v6 }
 0x3d4   :  { %1408 = vmatpush3.msra.mxu1 %v1610_v9 }
 0x3d5   :  { %1409 = vmatprep.subr.mxu1 %v1542_v6 }
 0x3d6   :  { %1410 = vmatpush3.msra.mxu1 %v1619_v11 }
 0x3d7   :  { %1411 = vmatprep.subr.mxu1 %v1542_v6 }
 0x3d8   :  { %1412 = vmatpush3.msra.mxu1 %v1636_v15 }
 0x3d9   :  { %1413 = vmatprep.subr.mxu1 %v1542_v6 }
 0x3da   :  { %1414 = vmatpush3.msra.mxu1 %v1649_v18 }
 0x3db   :  { %1415 = vmatprep.subr.mxu1 %v1542_v6 }
 0x3dc   :  { %1416 = vmatpush3.msra.mxu1 %v1658_v20 }
 0x3dd   :  { %1417 = vmatprep.subr.mxu1 %v1542_v6 }
 0x3de   :  { %1418 = vmatpush3.msra.mxu1 %v1668_v22 }
 0x3df   :  { %1419 = vmatprep.subr.mxu1 %v1542_v6 }
 0x3e0   :  { %1420 = vmatpush3.msra.mxu1 %v1678_v24 }
 0x3e1   :  { %1421 = vmatprep.subr.mxu1 %v1542_v6 }
 0x3e2   :  { %1422 = vmatpush3.msra.mxu1 %v1688_v26 }
 0x3e3   :  { %1423 = vmatprep.subr.mxu1 %v1542_v6 }
 0x3e4   :  { %1424 = vmatpush3.msra.mxu1 %v1698_v28 }
 0x3e5   :  { %1425 = vmatprep.subr.mxu1 %v1542_v6 }
 0x3e6   :  { %1426 = vmatpush3.msra.mxu1 %v1708_v30 }
 0x3e7   :  { %1427 = vmatprep.subr.mxu1 %v1542_v6 }
 0x3e8   :  { %1428 = vmatpush3.msra.mxu1 %v1718_v32 }
 0x3e9   :  { %1429 = vmatprep.subr.mxu1 %v1542_v6 }
 0x3ea   :  { %1430 = vmatpush3.msra.mxu1 %v1728_v34 }
 0x3eb   :  { %1431 = vmatprep.subr.mxu1 %v1542_v6 }
 0x3ec   :  { %1432 = vmatpush3.msra.mxu1 %v1738_v36 }
 0x3ed   :  { %1433 = vmatprep.subr.mxu1 %v1542_v6 }
 0x3ee   :  { %1434 = vmatpush3.msra.mxu1 %v1748_v38 }
 0x3ef   :  { %1435 = vmatprep.subr.mxu1 %v1542_v6 }
 0x3f0   :  { %1436 = vmatpush3.msra.mxu1 %v1758_v40 }
 0x491   :  { %v583_v29 = vpop.f32.mrf.mxu1 }
 0x492   :  { %v587_v31 = vadd.f32 %v583_v29, %v1884_v0 }
 0x493   :  { %v1369_v33 = vpop.f32.mrf.mxu1 }
 0x494   :  { %v588_v35 = vadd.f32 %v1840_v57, %v587_v31 }
 0x496   :  { %1533 = vtanh.f32 %v588_v35 }
 0x4a3   :  { %v2006_v37 = vpop.eup %1533 }
 0x4a4   :  { %1403 = vmatmul.mubr.f32.vlgmr.msra.gmra.mxu0 %v2006_v37 }
 0x4a5   :  { %1441 = vmatpush3.msra.mxu0 %v1599_v7  ;;  %1472 = vmatprep.mubr.msk.f32.mxu0 %vm1543_vm0, %v1542_v6  ;;  %v824_v7 = vld [vmem:[%s2132_s4 + $0x78] sm:$0xff] }
 0x4a6   :  { %1442 = vmatprep.subr.mxu0 %v1542_v6  ;;  %1475 = vmatprep.subr.mxu1 %v824_v7 }
 0x4a7   :  { %1443 = vmatpush3.msra.mxu0 %v1610_v9 }
 0x4a8   :  { %1444 = vmatprep.subr.mxu0 %v1542_v6 }
 0x4a9   :  { %1445 = vmatpush3.msra.mxu0 %v1619_v11 }
 0x4aa   :  { %1446 = vmatprep.subr.mxu0 %v1542_v6 }
 0x4ab   :  { %1447 = vmatpush3.msra.mxu0 %v1636_v15 }
 0x4ac   :  { %1448 = vmatprep.subr.mxu0 %v1542_v6 }
 0x4ad   :  { %1449 = vmatpush3.msra.mxu0 %v1649_v18 }
 0x4ae   :  { %1450 = vmatprep.subr.mxu0 %v1542_v6 }
 0x4af   :  { %1451 = vmatpush3.msra.mxu0 %v1658_v20 }
 0x4b0   :  { %1452 = vmatprep.subr.mxu0 %v1542_v6 }
 0x4b1   :  { %1453 = vmatpush3.msra.mxu0 %v1668_v22  ;;  %v823_v22 = vld [vmem:[%s2132_s4 + $0x70] sm:$0xff] }
 0x4b2   :  { %1454 = vmatprep.subr.mxu0 %v1542_v6 }
 0x4b3   :  { %1455 = vmatpush3.msra.mxu0 %v1678_v24  ;;  %v821_v24 = vld [vmem:[%s2132_s4 + $0x60] sm:$0xff] }
 0x4b4   :  { %1456 = vmatprep.subr.mxu0 %v1542_v6 }
 0x4b5   :  { %1457 = vmatpush3.msra.mxu0 %v1688_v26  ;;  %v820_v26 = vld [vmem:[%s2132_s4 + $0x58] sm:$0xff] }
 0x4b6   :  { %1458 = vmatprep.subr.mxu0 %v1542_v6 }
 0x4b7   :  { %1459 = vmatpush3.msra.mxu0 %v1698_v28  ;;  %v819_v28 = vld [vmem:[%s2132_s4 + $0x50] sm:$0xff] }
 0x4b8   :  { %1460 = vmatprep.subr.mxu0 %v1542_v6 }
 0x4b9   :  { %1461 = vmatpush3.msra.mxu0 %v1708_v30  ;;  %v818_v30 = vld [vmem:[%s2132_s4 + $0x48] sm:$0xff] }
 0x4ba   :  { %1462 = vmatprep.subr.mxu0 %v1542_v6 }
 0x4bb   :  { %1463 = vmatpush3.msra.mxu0 %v1718_v32  ;;  %v817_v32 = vld [vmem:[%s2132_s4 + $0x40] sm:$0xff] }
 0x4bc   :  { %1464 = vmatprep.subr.mxu0 %v1542_v6 }
 0x4bd   :  { %1465 = vmatpush3.msra.mxu0 %v1728_v34  ;;  %v816_v34 = vld [vmem:[%s2132_s4 + $0x38] sm:$0xff] }
 0x4be   :  { %1466 = vmatprep.subr.mxu0 %v1542_v6 }
 0x4bf   :  { %1467 = vmatpush3.msra.mxu0 %v1738_v36  ;;  %v815_v36 = vld [vmem:[%s2132_s4 + $0x30] sm:$0xff] }
 0x4c0   :  { %1468 = vmatprep.subr.mxu0 %v1542_v6 }
 0x4c1   :  { %1469 = vmatpush3.msra.mxu0 %v1748_v38  ;;  %v814_v38 = vld [vmem:[%s2132_s4 + $0x28] sm:$0xff] }
 0x4c2   :  { %1470 = vmatprep.subr.mxu0 %v1542_v6  ;;  %v822_v6 = vld [vmem:[%s2132_s4 + $0x68] sm:$0xff] }
 0x4c3   :  { %1471 = vmatpush3.msra.mxu0 %v1758_v40  ;;  %v812_v40 = vld [vmem:[%s2132_s4 + $0x18] sm:$0xff] }
 0x564   :  { %v656_v9 = vpop.f32.mrf.mxu0 }
 0x565   :  { %v660_v11 = vadd.f32 %v1882_v63, %v656_v9 }
 0x566   :  { %v1404_v15 = vpop.f32.mrf.mxu0 }
 0x567   :  { %v661_v18 = vadd.f32 %v1840_v57, %v660_v11 }
 0x569   :  { %1535 = vtanh.f32 %v661_v18 }
 0x576   :  { %v1536_v20 = vpop.eup %1535 }
 0x577   :  { %1438 = vmatmul.mubr.f32.vlgmr.msra.gmra.mxu1 %v1536_v20 }
 0x578   :  { %1476 = vmatpush3.msra.mxu1 %v824_v7  ;;  %1507 = vmatprep.mubr.f32.mxu1 %v1843_v60 }
 0x579   :  { %1477 = vmatprep.subr.mxu1 %v823_v22 }
 0x57a   :  { %1478 = vmatpush3.msra.mxu1 %v823_v22 }
 0x57b   :  { %1479 = vmatprep.subr.mxu1 %v822_v6 }
 0x57c   :  { %1480 = vmatpush3.msra.mxu1 %v822_v6 }
 0x57d   :  { %1481 = vmatprep.subr.mxu1 %v821_v24 }
 0x57e   :  { %1482 = vmatpush3.msra.mxu1 %v821_v24 }
 0x57f   :  { %1483 = vmatprep.subr.mxu1 %v820_v26 }
 0x580   :  { %1484 = vmatpush3.msra.mxu1 %v820_v26 }
 0x581   :  { %1485 = vmatprep.subr.mxu1 %v819_v28 }
 0x582   :  { %1486 = vmatpush3.msra.mxu1 %v819_v28 }
 0x583   :  { %1487 = vmatprep.subr.mxu1 %v818_v30 }
 0x584   :  { %1488 = vmatpush3.msra.mxu1 %v818_v30 }
 0x585   :  { %1489 = vmatprep.subr.mxu1 %v817_v32 }
 0x586   :  { %1490 = vmatpush3.msra.mxu1 %v817_v32 }
 0x587   :  { %1491 = vmatprep.subr.mxu1 %v816_v34 }
 0x588   :  { %1492 = vmatpush3.msra.mxu1 %v816_v34 }
 0x589   :  { %1493 = vmatprep.subr.mxu1 %v815_v36 }
 0x58a   :  { %1494 = vmatpush3.msra.mxu1 %v815_v36 }
 0x58b   :  { %1495 = vmatprep.subr.mxu1 %v814_v38 }
 0x58c   :  { %1496 = vmatpush3.msra.mxu1 %v814_v38 }
 0x58d   :  { %1497 = vmatprep.subr.mxu1 %v813_v39 }
 0x58e   :  { %1498 = vmatpush3.msra.mxu1 %v813_v39 }
 0x58f   :  { %1499 = vmatprep.subr.mxu1 %v812_v40 }
 0x590   :  { %1500 = vmatpush3.msra.mxu1 %v812_v40 }
 0x591   :  { %1501 = vmatprep.subr.mxu1 %v811_v41 }
 0x592   :  { %1502 = vmatpush3.msra.mxu1 %v811_v41 }
 0x593   :  { %1503 = vmatprep.subr.mxu1 %v810_v42 }
 0x594   :  { %1504 = vmatpush3.msra.mxu1 %v810_v42 }
 0x595   :  { %1505 = vmatprep.subr.mxu1 %v809_v43 }
 0x596   :  { %1506 = vmatpush3.msra.mxu1 %v809_v43 }
 0x597   :  { %1508 = vmatmul.mubr.f32.vlgmr.msra.gmra.mxu1 %v1891_v10 }
 0x598   :  { %1510 = vmatprep.mubr.f32.mxu1 %v1929_v17 }
 0x59b   :  { %1511 = vmatmul.mubr.f32.gmra.mxu1 %v1968_v27 }
 0x59c   :  { %1513 = vmatprep.mubr.f32.mxu1 %v2006_v37 }
 0x59f   :  { %1514 = vmatmul.mubr.f32.gmra.mxu1 %v1536_v20 }
 0x637   :  { %v729_v44 = vpop.f32.mrf.mxu1 }
 0x638   :  { %v733_v45 = vadd.f32 %v729_v44, %v1888_v2 }
 0x639   :  { %v1439_v46 = vpop.f32.mrf.mxu1 }
 0x63a   :  { %v734_v47 = vadd.f32 %v1840_v57, %v733_v45 }
 0x63c   :  { %1537 = vtanh.f32 %v734_v47 }
 0x649   :  { %v1538_v48 = vpop.eup %1537 }
 0x64a   :  { %1473 = vmatmul.mubr.f32.vlgmr.msra.gmra.mxu0 %v1538_v48  ;;  %1516 = vmatprep.mubr.f32.mxu1 %v1538_v48 }
 0x657   :  { %v1509_v50 = vpop.f32.mrf.mxu1 }
 0x658   :  { %v904_v51 = vadd.f32 %v1509_v50, %v966_v49 }
 0x659   :  { %v898_v52 = vpop.f32.mrf.mxu1 }
 0x65a   :  { %938 = vst [vmem:[%s2134_s6 + $0x8] sm:$0xff] %v904_v51  ;;  %v899_v53 = vadd.f32 %v966_v49, %v898_v52 }
 0x65b   :  { %v1512_v54 = vpop.f32.mrf.mxu1 }
 0x65c   :  { %937 = vst [vmem:[%s2134_s6] sm:$0xff] %v899_v53  ;;  %v914_v55 = vadd.f32 %v1512_v54, %v966_v49 }
 0x65d   :  { %v908_v56 = vpop.f32.mrf.mxu1 }
 0x65e   :  { %940 = vst [vmem:[%s2134_s6 + $0x18] sm:$0xff] %v914_v55  ;;  %v909_v58 = vadd.f32 %v966_v49, %v908_v56 }
 0x65f   :  { %v1515_v59 = vpop.f32.mrf.mxu1 }
 0x660   :  { %939 = vst [vmem:[%s2134_s6 + $0x10] sm:$0xff] %v909_v58  ;;  %v924_v60 = vadd.f32 %v1515_v59, %v966_v49 }
 0x661   :  { %v918_v61 = vpop.f32.mrf.mxu1 }
 0x662   :  { %942 = vst [vmem:[%s2134_s6 + $0x28] sm:$0xff] %v924_v60  ;;  %v919_v62 = vadd.f32 %v966_v49, %v918_v61 }
 0x664   :  { %941 = vst [vmem:[%s2134_s6 + $0x20] sm:$0xff] %v919_v62 }
 0x70a   :  { %v802_v63 = vpop.f32.mrf.mxu0 }
 0x70b   :  { %v806_v0 = vadd.f32 %v1886_v1, %v802_v63 }
 0x70c   :  { %v1474_v2 = vpop.f32.mrf.mxu0 }
 0x70d   :  { %v807_v3 = vadd.f32 %v1840_v57, %v806_v0 }
 0x70f   :  { %1539 = vtanh.f32 %v807_v3 }
 0x71c   :  { %v1540_v4 = vpop.eup %1539 }
 0x71d   :  { %1517 = vmatmul.mubr.f32.gmra.mxu1 %v1540_v4 }
 0x7dd   :  { %v1518_v5 = vpop.f32.mrf.mxu1 }
 0x7de   :  { %v934_v8 = vadd.f32 %v1518_v5, %v966_v49 }
 0x7df   :  { %v928_v10 = vpop.f32.mrf.mxu1 }
 0x7e0   :  { %944 = vst [vmem:[%s2134_s6 + $0x38] sm:$0xff] %v934_v8  ;;  %v929_v12 = vadd.f32 %v966_v49, %v928_v10 }
 0x7e2   :  { %943 = vst [vmem:[%s2134_s6 + $0x30] sm:$0xff] %v929_v12 }

</bundles_post_ra>
